<compile_context>
chip_gen: v5e
topology: v5e:2x2
jax: 0.10.0
libtpu: 0.0.40
codegen_flags: <defaults>
</compile_context>

<pallas_src>
import jax
import jax.numpy as jnp
import numpy as np
from jax import lax
from jax.experimental import pallas as pl
from jax.experimental.pallas import tpu as pltpu


def _attention_kernel(xq_ref, xg_ref, wq_ref, wkv_ref, wa_ref, out_ref, k_sc, v_sc):
    # Shapes (per grid step):
    #   xq_ref : (C, TN)      xg_ref : (C, 4*M)
    #   wq_ref : (Ca, C)      wkv_ref: (Ca+Cs, C)    wa_ref : (C, Cs)  [gamma folded in]
    #   out_ref: (C, TN)      k_sc   : (Ca, M)       v_sc   : (Cs, M)
    Ca = k_sc.shape[0]
    M = k_sc.shape[1]
    cd = k_sc.dtype                               # compute (MXU operand) dtype
    lowp = jnp.dtype(cd) != jnp.dtype(jnp.float32)

    x = xq_ref[...]                               # (C, TN), input dtype
    xc = x.astype(cd)

    # ---- K / V: computed once per batch element, cached across N tiles -------------
    @pl.when(pl.program_id(1) == 0)
    def _():
        xg = xg_ref[...].astype(cd)               # (C, 4M)
        kv = jnp.dot(wkv_ref[...].astype(cd), xg,
                     preferred_element_type=jnp.float32)          # (Ca+Cs, 4M)
        # 2x2 max-pool == elementwise max over the 4 window-position slices.
        pooled = jnp.maximum(jnp.maximum(kv[:, 0 * M:1 * M], kv[:, 1 * M:2 * M]),
                             jnp.maximum(kv[:, 2 * M:3 * M], kv[:, 3 * M:4 * M]))
        k_sc[...] = pooled[:Ca, :].astype(cd)     # (Ca, M)
        v_sc[...] = pooled[Ca:, :].astype(cd)     # (Cs, M)

    # ---- query projection for this N tile ------------------------------------------
    q = jnp.dot(wq_ref[...].astype(cd), xc,
                preferred_element_type=jnp.float32)               # (Ca, TN) f32

    # ---- attn = softmax_over_M( K^T Q )   (torch: softmax(bmm(k^T, q), dim=1)) -----
    logits = lax.dot_general(k_sc[...], q.astype(cd),
                             (((0,), (0,)), ((), ())),
                             preferred_element_type=jnp.float32)  # (M, TN) f32
    lmax = jnp.max(logits, axis=0, keepdims=True)                 # (1, TN)
    e = jnp.exp(logits - lmax)
    denom = jnp.sum(e, axis=0, keepdims=True)
    if lowp:
        attn = e * pl.reciprocal(denom, approx=True)              # EUP reciprocal
    else:
        attn = e / denom                                          # exact for f32 path
    # softmax stays in f32 regardless of compute dtype (v5e has no bf16 VPU/EUP).

    # ---- V @ attn, output projection (gamma already folded into wa), residual ------
    o = jnp.dot(v_sc[...], attn.astype(cd),
                preferred_element_type=jnp.float32)               # (Cs, TN)
    a = jnp.dot(wa_ref[...].astype(cd), o.astype(cd),
                preferred_element_type=jnp.float32)               # (C, TN)

    out_ref[...] = (a + x).astype(out_ref.dtype)


def _pick_tile_n(N):
    for tn in (512, 256, 128):                    # <=512 keeps v7x's 64 MiB VMEM happy
        if N % tn == 0:
            return tn
    return N                                      # fallback: untiled (odd sizes)


def attention_pallas(x, wq, wk, wv, wa, gamma, *, compute_dtype=None, tile_n=None):
    B, C, H, W = x.shape
    Ca = wq.shape[0]
    Cs = wv.shape[0]
    N = H * W
    M = (H // 2) * (W // 2)
    cd = jnp.dtype(compute_dtype) if compute_dtype is not None else jnp.dtype(x.dtype)

    if tile_n is None:
        tile_n = _pick_tile_n(N)
    assert N % tile_n == 0, "N must be divisible by tile_n"
    n_tiles = N // tile_n

    # Glue: layout plumbing only (no compute beyond the scalar gamma fold).
    xq = x.reshape(B, C, N)
    # Packed pooling-window planes, g-major along the last axis: (B, C, 4*M).
    # TODO(synk): when W is a multiple of 128 this duplicate read of x could be dropped
    # by pooling wk@x / wv@x in-kernel with strided lane maxes.
    xg = (x.reshape(B, C, H // 2, 2, W // 2, 2)
            .transpose(0, 1, 3, 5, 2, 4)          # (B, C, i, j, H/2, W/2)
            .reshape(B, C, 4 * M))
    wkv = jnp.concatenate([wk, wv], axis=0)       # (Ca+Cs, C) stacked key/value weights
    wa_g = wa * gamma.reshape(-1)[0]              # fold gamma into the output projection

    out = pl.pallas_call(
        _attention_kernel,
        out_shape=jax.ShapeDtypeStruct((B, C, N), x.dtype),
        grid_spec=pltpu.PrefetchScalarGridSpec(
            num_scalar_prefetch=0,
            grid=(B, n_tiles),
            in_specs=[
                pl.BlockSpec((pl.Squeezed(), C, tile_n), lambda b, n: (b, 0, n)),
                # xg ignores the N index -> stays resident in VMEM across N tiles.
                pl.BlockSpec((pl.Squeezed(), C, 4 * M), lambda b, n: (b, 0, 0)),
                pl.BlockSpec((Ca, C), lambda b, n: (0, 0)),
                pl.BlockSpec((Ca + Cs, C), lambda b, n: (0, 0)),
                pl.BlockSpec((C, Cs), lambda b, n: (0, 0)),
            ],
            out_specs=pl.BlockSpec((pl.Squeezed(), C, tile_n), lambda b, n: (b, 0, n)),
            scratch_shapes=[
                pltpu.VMEM((Ca, M), cd),          # cached K
                pltpu.VMEM((Cs, M), cd),          # cached V
            ],
        ),
        compiler_params=pltpu.CompilerParams(
            dimension_semantics=("parallel", "arbitrary"),
            vmem_limit_bytes=32 * 1024 * 1024,    # raises v5e's 16 MiB scoped default
        ),
    )(xq, xg, wq, wkv, wa_g)
    return out.reshape(B, C, H, W)


def attention_reference(x, wq, wk, wv, wa, gamma):
    """Pure-JAX reference mirroring the PyTorch forward."""
    B, C, H, W = x.shape
    Ca = wq.shape[0]
    Cs = wv.shape[0]
    N = H * W
    M = (H // 2) * (W // 2)

    def conv1x1(w, y):
        return jnp.einsum('oc,bchw->bohw', w, y)

    def maxpool2(y):
        b, c, h, w_ = y.shape
        return y.reshape(b, c, h // 2, 2, w_ // 2, 2).max(axis=(3, 5))

    q = conv1x1(wq, x).reshape(B, Ca, N)
    k = maxpool2(conv1x1(wk, x)).reshape(B, Ca, M)
    v = maxpool2(conv1x1(wv, x)).reshape(B, Cs, M)
    attn = jnp.einsum('bcm,bcn->bmn', k, q)       # (B, M, N)
    attn = jax.nn.softmax(attn, axis=1)           # softmax over M (torch dim=1)
    o = jnp.einsum('bcm,bmn->bcn', v, attn)       # (B, Cs, N)
    a = jnp.einsum('oc,bcn->bon', wa, o).reshape(B, C, H, W)
    return gamma.reshape(1, 1, 1, 1) * a + x


def _spectral_normalize(w):
    # spectral_norm on a 1x1 conv weight (out, in): divide by largest singular value.
    # TODO(synk): torch uses a single power-iteration estimate per forward; we apply the exact sigma.
    s = np.linalg.svd(np.asarray(w), compute_uv=False)[0]
    return (w / s).astype(jnp.float32)


if __name__ == "__main__":
    B, C, H, W = 2, 16, 16, 16          # channels=16 -> C_attn = 2, C_sc = 8
    Ca, Cs = C // 8, C // 2

    key = jax.random.PRNGKey(0)
    kx, k1, k2, k3, k4 = jax.random.split(key, 5)
    ortho = jax.nn.initializers.orthogonal()

    wq = _spectral_normalize(ortho(k1, (Ca, C), jnp.float32))
    wk = _spectral_normalize(ortho(k2, (Ca, C), jnp.float32))
    wv = _spectral_normalize(ortho(k3, (Cs, C), jnp.float32))
    wa = _spectral_normalize(ortho(k4, (C, Cs), jnp.float32))
    # torch __init__ sets gamma = 0 (output would equal input); use a nonzero
    # value here so the attention path is actually exercised in the check.
    gamma = jnp.array([0.5], jnp.float32)

    x = jax.random.normal(kx, (B, C, H, W), jnp.float32)
    ref = attention_reference(x, wq, wk, wv, wa, gamma)

    # f32 path; tile_n=128 -> grid=(B, 2) so the K/V-cache-across-N-tiles path is
    # exercised. Strict tolerance.
    out = attention_pallas(x, wq, wk, wv, wa, gamma, tile_n=128)
    out = jax.block_until_ready(out)
    assert out.shape == (B, C, H, W)
    np.testing.assert_allclose(np.asarray(out), np.asarray(ref), rtol=1e-5, atol=1e-5)

    # bf16 MXU-operand path (the v6e/v7x fast path); softmax stays f32. Loose sanity
    # tolerance appropriate for bf16 operands.
    out_bf16 = attention_pallas(x, wq, wk, wv, wa, gamma, tile_n=128,
                                compute_dtype=jnp.bfloat16)
    out_bf16 = jax.block_until_ready(out_bf16)
    np.testing.assert_allclose(np.asarray(out_bf16), np.asarray(ref),
                               rtol=5e-2, atol=5e-2)

    print("KERNEL_OK")
</pallas_src>

<mosaic_0001>
module attributes {stable_mosaic.version = 11 : i64} {
  func.func @_attention_kernel(%arg0: i32, %arg1: i32, %arg2: memref<1x16x128xf32, #tpu.memory_space<vmem>>, %arg3: memref<1x16x256xf32, #tpu.memory_space<vmem>>, %arg4: memref<2x16xf32, #tpu.memory_space<vmem>>, %arg5: memref<10x16xf32, #tpu.memory_space<vmem>>, %arg6: memref<16x8xf32, #tpu.memory_space<vmem>>, %arg7: memref<1x16x128xf32, #tpu.memory_space<vmem>>, %arg8: memref<2x64xf32, #tpu.memory_space<vmem>>, %arg9: memref<8x64xf32, #tpu.memory_space<vmem>>) attributes {dimension_semantics = [#tpu.dimension_semantics<parallel>, #tpu.dimension_semantics<arbitrary>], iteration_bounds = array<i64: 2, 2>, scalar_prefetch = 0 : i64, scratch_operands = 2 : i64, tpu.core_type = #tpu.core_type<tc>, window_params = [{transform_indices = @transform_0, window_bounds = array<i64: 1, 16, 128>}, {transform_indices = @transform_1, window_bounds = array<i64: 1, 16, 256>}, {pipeline_mode = #tpu.pipeline_mode<synchronous>, transform_indices = @transform_2, window_bounds = array<i64: 2, 16>}, {pipeline_mode = #tpu.pipeline_mode<synchronous>, transform_indices = @transform_3, window_bounds = array<i64: 10, 16>}, {pipeline_mode = #tpu.pipeline_mode<synchronous>, transform_indices = @transform_4, window_bounds = array<i64: 16, 8>}, {transform_indices = @transform_5, window_bounds = array<i64: 1, 16, 128>}]} {
    %c0 = arith.constant 0 : index
    %c0_0 = arith.constant 0 : index
    %c0_1 = arith.constant 0 : index
    %0 = vector.load %arg2[%c0, %c0_0, %c0_1] : memref<1x16x128xf32, #tpu.memory_space<vmem>>, vector<1x16x128xf32>
    %1 = vector.shape_cast %0 : vector<1x16x128xf32> to vector<16x128xf32>
    %c0_i32 = arith.constant 0 : i32
    %2 = arith.cmpi eq, %arg1, %c0_i32 : i32
    %3 = arith.extui %2 : i1 to i32
    %c0_i32_2 = arith.constant 0 : i32
    %4 = arith.cmpi ne, %3, %c0_i32_2 : i32
    scf.if %4 {
      %c0_19 = arith.constant 0 : index
      %c0_20 = arith.constant 0 : index
      %c0_21 = arith.constant 0 : index
      %26 = vector.load %arg3[%c0_19, %c0_20, %c0_21] : memref<1x16x256xf32, #tpu.memory_space<vmem>>, vector<1x16x256xf32>
      %27 = vector.shape_cast %26 : vector<1x16x256xf32> to vector<16x256xf32>
      %c0_22 = arith.constant 0 : index
      %c0_23 = arith.constant 0 : index
      %28 = vector.load %arg5[%c0_22, %c0_23] : memref<10x16xf32, #tpu.memory_space<vmem>>, vector<10x16xf32>
      %cst_24 = arith.constant dense<0.000000e+00> : vector<10x256xf32>
      %29 = tpu.matmul %28, %27, %cst_24 {dimension_numbers = #tpu.dot_dimension_numbers<[1], [0], [0], [1], [0, 0, 1, 1], [], []>} : vector<10x16xf32>, vector<16x256xf32>, vector<10x256xf32> -> vector<10x256xf32>
      %30 = vector.extract_strided_slice %29 {offsets = [0, 0], sizes = [10, 64], strides = [1, 1]} : vector<10x256xf32> to vector<10x64xf32>
      %31 = vector.extract_strided_slice %29 {offsets = [0, 64], sizes = [10, 64], strides = [1, 1]} : vector<10x256xf32> to vector<10x64xf32>
      %32 = arith.maximumf %30, %31 : vector<10x64xf32>
      %33 = vector.extract_strided_slice %29 {offsets = [0, 128], sizes = [10, 64], strides = [1, 1]} : vector<10x256xf32> to vector<10x64xf32>
      %34 = vector.extract_strided_slice %29 {offsets = [0, 192], sizes = [10, 64], strides = [1, 1]} : vector<10x256xf32> to vector<10x64xf32>
      %35 = arith.maximumf %33, %34 : vector<10x64xf32>
      %36 = arith.maximumf %32, %35 : vector<10x64xf32>
      %37 = vector.extract_strided_slice %36 {offsets = [0, 0], sizes = [2, 64], strides = [1, 1]} : vector<10x64xf32> to vector<2x64xf32>
      %c0_25 = arith.constant 0 : index
      %c0_26 = arith.constant 0 : index
      %38 = vector.load %arg8[%c0_25, %c0_26] : memref<2x64xf32, #tpu.memory_space<vmem>>, vector<2x64xf32>
      tpu.vector_store %arg8[%c0_25, %c0_26], %37 {strides = array<i32>} : memref<2x64xf32, #tpu.memory_space<vmem>>, vector<2x64xf32>,
      %39 = vector.extract_strided_slice %36 {offsets = [2, 0], sizes = [8, 64], strides = [1, 1]} : vector<10x64xf32> to vector<8x64xf32>
      %c0_27 = arith.constant 0 : index
      %c0_28 = arith.constant 0 : index
      %40 = vector.load %arg9[%c0_27, %c0_28] : memref<8x64xf32, #tpu.memory_space<vmem>>, vector<8x64xf32>
      tpu.vector_store %arg9[%c0_27, %c0_28], %39 {strides = array<i32>} : memref<8x64xf32, #tpu.memory_space<vmem>>, vector<8x64xf32>,
    } else {
    }
    %c0_3 = arith.constant 0 : index
    %c0_4 = arith.constant 0 : index
    %5 = vector.load %arg4[%c0_3, %c0_4] : memref<2x16xf32, #tpu.memory_space<vmem>>, vector<2x16xf32>
    %cst = arith.constant dense<0.000000e+00> : vector<2x128xf32>
    %6 = tpu.matmul %5, %1, %cst {dimension_numbers = #tpu.dot_dimension_numbers<[1], [0], [0], [1], [0, 0, 1, 1], [], []>} : vector<2x16xf32>, vector<16x128xf32>, vector<2x128xf32> -> vector<2x128xf32>
    %c0_5 = arith.constant 0 : index
    %c0_6 = arith.constant 0 : index
    %7 = vector.load %arg8[%c0_5, %c0_6] : memref<2x64xf32, #tpu.memory_space<vmem>>, vector<2x64xf32>
    %cst_7 = arith.constant dense<0.000000e+00> : vector<64x128xf32>
    %8 = tpu.matmul %7, %6, %cst_7 {dimension_numbers = #tpu.dot_dimension_numbers<[0], [0], [1], [1], [0, 1, 1, 1], [], []>} : vector<2x64xf32>, vector<2x128xf32>, vector<64x128xf32> -> vector<64x128xf32>
    %cst_8 = arith.constant dense<0xFF800000> : vector<128xf32>
    %9 = vector.multi_reduction <maximumf>, %8, %cst_8 [0] : vector<64x128xf32> to vector<128xf32>
    %10 = vector.shape_cast %9 : vector<128xf32> to vector<1x128xf32>
    %11 = vector.broadcast %10 : vector<1x128xf32> to vector<64x128xf32>
    %12 = arith.subf %8, %11 : vector<64x128xf32>
    %13 = math.exp %12 : vector<64x128xf32>
    %cst_9 = arith.constant dense<0.000000e+00> : vector<128xf32>
    %14 = vector.multi_reduction <add>, %13, %cst_9 [0] : vector<64x128xf32> to vector<128xf32>
    %15 = vector.shape_cast %14 : vector<128xf32> to vector<1x128xf32>
    %16 = vector.broadcast %15 : vector<1x128xf32> to vector<64x128xf32>
    %17 = arith.divf %13, %16 : vector<64x128xf32>
    %c0_10 = arith.constant 0 : index
    %c0_11 = arith.constant 0 : index
    %18 = vector.load %arg9[%c0_10, %c0_11] : memref<8x64xf32, #tpu.memory_space<vmem>>, vector<8x64xf32>
    %cst_12 = arith.constant dense<0.000000e+00> : vector<8x128xf32>
    %19 = tpu.matmul %18, %17, %cst_12 {dimension_numbers = #tpu.dot_dimension_numbers<[1], [0], [0], [1], [0, 0, 1, 1], [], []>} : vector<8x64xf32>, vector<64x128xf32>, vector<8x128xf32> -> vector<8x128xf32>
    %c0_13 = arith.constant 0 : index
    %c0_14 = arith.constant 0 : index
    %20 = vector.load %arg6[%c0_13, %c0_14] : memref<16x8xf32, #tpu.memory_space<vmem>>, vector<16x8xf32>
    %cst_15 = arith.constant dense<0.000000e+00> : vector<16x128xf32>
    %21 = tpu.matmul %20, %19, %cst_15 {dimension_numbers = #tpu.dot_dimension_numbers<[1], [0], [0], [1], [0, 0, 1, 1], [], []>} : vector<16x8xf32>, vector<8x128xf32>, vector<16x128xf32> -> vector<16x128xf32>
    %22 = arith.addf %21, %1 : vector<16x128xf32>
    %c0_16 = arith.constant 0 : index
    %c0_17 = arith.constant 0 : index
    %c0_18 = arith.constant 0 : index
    %23 = vector.load %arg7[%c0_16, %c0_17, %c0_18] : memref<1x16x128xf32, #tpu.memory_space<vmem>>, vector<1x16x128xf32>
    %24 = vector.shape_cast %23 : vector<1x16x128xf32> to vector<16x128xf32>
    %25 = vector.shape_cast %22 : vector<16x128xf32> to vector<1x16x128xf32>
    tpu.vector_store %arg7[%c0_16, %c0_17, %c0_18], %25 {strides = array<i32>} : memref<1x16x128xf32, #tpu.memory_space<vmem>>, vector<1x16x128xf32>,
    return
  }
  func.func @transform_0(%arg0: i32, %arg1: i32) -> (i32, i32, i32) {
    %c0_i32 = arith.constant 0 : i32
    %c0_i32_0 = arith.constant 0 : i32
    return %arg0, %c0_i32, %arg1 : i32, i32, i32
  }
  func.func @transform_1(%arg0: i32, %arg1: i32) -> (i32, i32, i32) {
    %c0_i32 = arith.constant 0 : i32
    %c0_i32_0 = arith.constant 0 : i32
    %c0_i32_1 = arith.constant 0 : i32
    return %arg0, %c0_i32, %c0_i32_0 : i32, i32, i32
  }
  func.func @transform_2(%arg0: i32, %arg1: i32) -> (i32, i32) {
    %c0_i32 = arith.constant 0 : i32
    %c0_i32_0 = arith.constant 0 : i32
    %c0_i32_1 = arith.constant 0 : i32
    return %c0_i32, %c0_i32_0 : i32, i32
  }
  func.func @transform_3(%arg0: i32, %arg1: i32) -> (i32, i32) {
    %c0_i32 = arith.constant 0 : i32
    %c0_i32_0 = arith.constant 0 : i32
    %c0_i32_1 = arith.constant 0 : i32
    return %c0_i32, %c0_i32_0 : i32, i32
  }
  func.func @transform_4(%arg0: i32, %arg1: i32) -> (i32, i32) {
    %c0_i32 = arith.constant 0 : i32
    %c0_i32_0 = arith.constant 0 : i32
    %c0_i32_1 = arith.constant 0 : i32
    return %c0_i32, %c0_i32_0 : i32, i32
  }
  func.func @transform_5(%arg0: i32, %arg1: i32) -> (i32, i32, i32) {
    %c0_i32 = arith.constant 0 : i32
    %c0_i32_0 = arith.constant 0 : i32
    return %arg0, %c0_i32, %arg1 : i32, i32, i32
  }
}

</mosaic_0001>

<bundles_post_ra>
// kernel: tpu_custom_call.1
= control target key start
LH: loop header
LB: loop body
LE: loop exit
PB: predicated region body
PF: predicated region fallthrough
CT: control target
= control target key end

     0   :  { %s1444_s0 = inlined_call_operand.hbm [shape: f32[2,16,256], index: 0, kind: input, shape index: {}]   ;;  %s1445_s1 = inlined_call_operand.hbm [shape: f32[2,16,256], index: 1, kind: input, shape index: {}]   ;;  %s1446_s2 = inlined_call_operand.vmem [shape: f32[2,16], index: 2, kind: input, shape index: {}]   ;;  %s1447_s3 = inlined_call_operand.vmem [shape: f32[10,16], index: 3, kind: input, shape index: {}]   ;;  %s1448_s4 = inlined_call_operand.vmem [shape: f32[16,8], index: 4, kind: input, shape index: {}]   ;;  %s1449_s5 = inlined_call_operand.hbm [shape: f32[2,16,256], index: 5, kind: output, shape index: {}]  }
   0x1   :  { %1459 = sst [smem:[#allocation18_spill]] %s1444_s0 }
   0x2   :  { %1460 = sst [smem:[#allocation19_spill]] %s1449_s5 }
   0x3   :  { %10 = vsyncpa [#allocation5], 0 }
   0x4   :  { %12 = vsyncpa [#allocation5 + $0x1], 0 }
   0x5   :  { %13 = vsyncpa [#allocation8], 0 }
   0x6   :  { %15 = vsyncpa [#allocation8 + $0x1], 0 }
   0x7   :  { %16 = vsyncpa [#allocation6], 0 }
   0x8   :  { %18 = vsyncpa [#allocation6 + $0x1], 0  ;;  %s1186_s18 = smov 0   ;;  %s1188_s19 = smov 0  }
   0x9   :  { %s1190_s20 = smov 0   ;;  %s1192_s21 = smov 0  }
   0xa   :  { %s1194_s22 = smov 0   ;;  %s1196_s23 = smov 0  }
   0xb   :  { %s1198_s24 = smov 0   ;;  %s1200_s25 = smov 0  }
   0xc   :  { %s1202_s26 = smov 0   ;;  %s1204_s27 = smov 0  }
   0xd   :  { %s1206_s28 = smov 0  }
   0xe LB: > { %1461 = sst [smem:[#allocation13_spill]] %s1142_s27  ;;  %s1450_s29 = sadd.s32 4294967295, %s1146_s28   ;;  %s1146_s28 = sphi %s1206_s28, %s24_s28   ;;  %s1142_s27 = sphi %s1204_s27, %s1480_s27   ;;  %s1138_s26 = sphi %s1202_s26, %s1488_s26   ;;  %s1134_s25 = sphi %s1200_s25, %s1478_s25   ;;  %s1130_s24 = sphi %s1198_s24, %s1487_s24   ;;  %s1126_s23 = sphi %s1196_s23, %s1486_s23   ;;  %s1122_s22 = sphi %s1194_s22, %s1485_s22   ;;  %s1118_s21 = sphi %s1192_s21, %s1484_s21   ;;  %s1114_s20 = sphi %s1190_s20, %s1483_s20   ;;  %s1110_s19 = sphi %s1188_s19, %s1482_s19   ;;  %s1106_s18 = sphi %s1186_s18, %s1481_s18  }
   0xf   : > { %s784_s30 = sadd.s32 4294967294, %s1146_s28   ;;  %s33_s6 = sadd.s32 1, %s1138_s26 }
  0x10   : > { %s36_s7 = sadd.s32 1, %s1142_s27  ;;  %p34_p0 = scmp.ge.s32.totalorder %s33_s6, 2 }
  0x11   : > { %s45_s8 = sadd.s32 1, %s1126_s23  ;;  %p52_p1 = scmp.ne.s32.totalorder %s1126_s23, %s1122_s22 }
  0x12   : > { %p53_p2 = scmp.eq.s32.totalorder %s1146_s28, 0  ;;  %s1490_s6 = smov (%p34_p0, %s33_s6), 0 }
  0x13   : > { %1462 = sst [smem:[#allocation14_spill]] %s1490_s6  ;;  %s1492_s7 = smov (!%p34_p0, %s36_s7), %s1142_s27 }
  0x14   : > { %s41_s9 = ssub.s32 %s1138_s26, %s1490_s6  ;;  %p1256_p3 = por %p53_p2, %p52_p1 }
  0x15   : > { %p38_p4 = scmp.ge.s32.totalorder %s1492_s7, 2  ;;  %p58_p5 = scmp.ne.s32.totalorder %s1122_s22, %s1118_s21 }
  0x16   : > { %p173_p6 = scmp.eq.s32.totalorder %s1450_s29, 3  ;;  %p179_p7 = scmp.eq.s32.totalorder %s784_s30, 3 }
  0x17   : > { %s1494_s7 = smov (%p38_p4, %s1492_s7), 0  ;;  %p843_p12 = scmp.lt.s32.totalorder %s1146_s28, 4 }
  0x18   : > { %1464 = sst [smem:[#allocation15_spill]] %s1494_s7  ;;  %p1266_p8 = por %p173_p6, %p52_p1 }
  0x19   : > { %p1273_p9 = por %p179_p7, %p58_p5  ;;  %s1279_s13 = ssub.s32 %s1142_s27, %s1494_s7 }
  0x1a   : > { %s1465_s11 = scalar_select %p1266_p8, 1, 0 }
  0x1b   : > { %s1467_s12 = scalar_select %p1273_p9, 1, 0 }
  0x1c   : > { %1466 = sst [smem:[#allocation16_spill]] %s1465_s11  ;;  %s42_s14 = sor.u32 %s41_s9, %s1279_s13 }
  0x1d   : > { %1468 = sst [smem:[#allocation17_spill]] %s1467_s12  ;;  %p69_p10 = scmp.eq.s32.totalorder %s1279_s13, 0 }
  0x1e   : > { %p43_p11 = scmp.eq.s32.totalorder %s42_s14, 0  ;;  %s208_s15 = sand.u32 1, %s1126_s23  }
  0x1f   : > { %s788_s16 = sshll.u32 %s1142_s27, 2  ;;  %s787_s30 = sshll.u32 %s208_s15, 4 }
  0x20   : > { %s1287_s17 = scalar_select %p43_p11, %s1126_s23, %s45_s8  }
  0x21   : > { %s216_s29 = sadd.s32 %s1138_s26, %s788_s16  ;;  %s212_s7 = scalar_lea.vmem [#allocation4], %s787_s30 }
  0x22   : > { %s789_s6 = sshll.u32 %s216_s29, 3  ;;  %s221_s12 = sshll.u32 %s212_s7, 4  ;;  %s222_s12 = int_to_ptr.vmem [resolvable:$true] %s221_s12 }
  0x23   : > { %s1469_s0 = sld [smem:[#allocation18_spill]]  ;;  %p833_p13 = pnand %p843_p12, %p1256_p3 }
  0x24   : > { %p793_p0 = scmp.ge.s32.totalorder %s1146_s28, 1  ;;  %s209_s29 = scalar_lea.sflag [#allocation5], %s208_s15 }
  0x25   : > { %s1457_s5 = smov 256   ;;  %s1149_s7 = smov 128  }
  0x26   : > { %p251_p1 = scmp.lt.s32.totalorder %s1146_s28, 5  ;;  %s1471_s10 = sadd.s32 4294967295, %s1146_s28  }
  0x27   : > { %p59_p6 = scmp.eq.s32.totalorder %s1471_s10, 0  ;;  %s71_s14 = sadd.s32 1, %s1114_s20 }
  0x28   : > { %p1300_p4 = pnand %p793_p0, %p251_p1  ;;  %p78_p7 = scmp.ne.s32.totalorder %s1114_s20, %s1110_s19 }
  0x29   : > { %s218_s9 = scalar_lea.hbm %s1469_s0, %s789_s6  ;;  %s1150_s6 = smov 8  }
  0x2a   : > { %s219_s8 = sshll.u32 %s218_s9, 4  ;;  %p1315_p3 = por %p59_p6, %p58_p5  ;;  %s220_s8 = int_to_ptr.hbm [resolvable:$true] %s219_s8 }
  0x2b   : > { %835 = dma.hbm_to_vmem [thread:$0]  (!%p833_p13), %s220_s8, 256, %s222_s12, %s209_s29, %s1457_s5, %s1149_s7, %s1150_s6  }
  0x2c   : > { %s1310_s16 = scalar_select %p69_p10, %s1114_s20, %s71_s14  }
  0x2d   : > { %p84_p11 = scmp.ne.s32.totalorder %s1110_s19, %s1106_s18  ;;  %s231_s12 = sand.u32 1, %s1114_s20  }
  0x2e   : > { %p80_p13 = por %p78_p7, %p53_p2  ;;  %s790_s9 = sshll.u32 %s231_s12, 5 }
  0x2f   : > { %p1326_p0 = por %p84_p11, %p59_p6  ;;  %s820_s8 = sshll.u32 %s1142_s27, 5 }
  0x30   : > { %s240_s7 = scalar_lea.hbm %s1445_s1, %s820_s8  ;;  %s235_s6 = scalar_lea.vmem [#allocation7], %s790_s9 }
  0x31   : > { %s243_s10 = sshll.u32 %s235_s6, 4  ;;  %s241_s14 = sshll.u32 %s240_s7, 4  ;;  %s244_s10 = int_to_ptr.vmem [resolvable:$true] %s243_s10  ;;  %s242_s14 = int_to_ptr.hbm [resolvable:$true] %s241_s14 }
  0x32   : > { %p836_p5 = pnand %p843_p12, %p80_p13  ;;  %s232_s18 = scalar_lea.sflag [#allocation8], %s231_s12 }
  0x33   : > { %s1151_s5 = smov 16   ;;  %s1474_s0 = smov 256  }
  0x34   : > { %838 = dma.hbm_to_vmem [thread:$0]  (!%p836_p5), %s242_s14, 512, %s244_s10, %s232_s18, %s1474_s0, %s1474_s0, %s1151_s5  }
  0x35   : > { %255 = sbr.rel (%p1300_p4) target bundleno = 1046 (0x416), region = 40  ;;  %s1341_s27 = sand.u32 (!%p1300_p4), 1, %s1122_s22  }
  0x36   : > { %s794_s9 = sshll.u32 (!%p1300_p4), %s1341_s27, 4  ;;  %s258_s8 = scalar_lea.sflag (!%p1300_p4), [#allocation5], %s1341_s27 }
  0x37   : > { %s261_s13 = scalar_lea.vmem (!%p1300_p4), [#allocation4], %s794_s9 }
  0x3a   : > { %1093 = dma.done.wait (%p1315_p3), %s258_s8, 256  }
  0x3b   : > { %1095 = vsyncadd (%p1315_p3), %s258_s8, 4294967040  ;;  %s267_s0 = sand.u32 1, %s1110_s19  }
  0x3c   : > { %s795_s5 = sshll.u32 %s267_s0, 5  ;;  %s268_s11 = scalar_lea.sflag [#allocation8], %s267_s0 }
  0x3d   : > { %s271_s12 = scalar_lea.vmem [#allocation7], %s795_s5 }
  0x3e   : > { %1097 = dma.done.wait (%p1326_p0), %s268_s11, 512  }
  0x3f   : > { %1099 = vsyncadd (%p1326_p0), %s268_s11, 4294966784  ;;  %v1354_v0 = vld [vmem:[%s261_s13] sm:$0xff]  ;;  %v1356_v1 = vld [vmem:[%s261_s13 + $0x8] sm:$0xff]  ;;  %s1358_s29 = scalar_lea.vmem [#allocation9], %s794_s9  ;;  %p797_p2 = scmp.ne.s32.totalorder %s1130_s24, 0 }
  0x40   : > { %s1152_s10 = smov (!%p797_p2), 64  }
  0x41   : > { %309 = sbr.rel (%p797_p2) target bundleno = 328 (0x148), region = 52 }
  0x46   : > { %v312_v2 = vld [vmem:[%s271_s12 + $0x10] sm:$0xff]  ;;  %v313_v3 = vld [vmem:[%s271_s12 + $0x18] sm:$0xff]  ;;  %v310_v4 = vld [vmem:[%s271_s12] sm:$0xff]  ;;  %vm316_vm0 = vcmask 130048   ;;  %vm391_vm1 = vcmask 517120   ;;  %vm393_vm2 = vcmask 523266  }
  0x47   : > { %337 = vmatpush.msra.mxu0 %v312_v2  ;;  %360 = vmatpush.msra.mxu1 %v313_v3  ;;  %v311_v5 = vld [vmem:[%s271_s12 + $0x8] sm:$0xff]  ;;  %v314_v6 = vld [vmem:[%s1447_s3] sm:$0xff]  ;;  %v315_v7 = vld [vmem:[%s1447_s3 + $0x8] sm:$0x3] }
  0x48   : > { %821 = vmatpush.msra.mxu2 %v312_v2  ;;  %823 = vmatpush.msra.mxu3 %v313_v3 }
  0x49   : > { %338 = vmatpush.msra.mxu0 %v310_v4  ;;  %361 = vmatpush.msra.mxu1 %v311_v5 }
  0x4a   : > { %798 = vmatmul.msk.f32.vlgmr.msra.gmra.mxu0 %vm316_vm0, %v314_v6  ;;  %800 = vmatmul.msk.f32.vlgmr.msra.gmra.mxu1 %vm316_vm0, %v314_v6 }
  0x4b   : > { %822 = vmatpush.msra.mxu2 %v310_v4  ;;  %824 = vmatpush.msra.mxu3 %v311_v5 }
  0x4c   : > { %799 = vmatmul.msk.f32.vlgmr.msra.gmra.mxu2 %vm316_vm0, %v315_v7  ;;  %801 = vmatmul.msk.f32.vlgmr.msra.gmra.mxu3 %vm316_vm0, %v315_v7 }
  0xc7   : > { %v340_v8 = vpop.f32.mrf.mxu0  ;;  %v363_v9 = vpop.f32.mrf.mxu1 }
  0xc8   : > { %381 = vrot.lane.b32.xlu1 %v363_v9, %s1152_s10  ;;  %371 = vrot.lane.b32.xlu0 %v340_v8, %s1152_s10 }
  0xcf   : > { %v343_v10 = vpop.f32.mrf.mxu2  ;;  %v366_v11 = vpop.f32.mrf.mxu3 }
  0xd0   : > { %383 = vrot.lane.b32.xlu1 %v366_v11, %s1152_s10  ;;  %373 = vrot.lane.b32.xlu0 %v343_v10, %s1152_s10 }
 0x13a   : > { %v382_v12 = vpop.permute.xlu1 %381  ;;  %v372_v13 = vpop.permute.xlu0 %371 }
 0x13b   : > { %v387_v14 = vmax.f32 %v363_v9, %v382_v12  ;;  %v377_v15 = vmax.f32 %v340_v8, %v372_v13 }
 0x13d   : > { %v389_v16 = vmax.f32 %v377_v15, %v387_v14 }
 0x13f   : > { %392 = vst.msk [vmem:[#allocation2] sm:$0x3] %vm391_vm1, %v389_v16 }
 0x140   : > { %394 = vst.msk [vmem:[#allocation3 - $0x2] sm:$0xfc] %vm393_vm2, %v389_v16 }
 0x142   : > { %v384_v17 = vpop.permute.xlu1 %383  ;;  %v374_v18 = vpop.permute.xlu0 %373 }
 0x143   : > { %v388_v19 = vmax.f32 %v366_v11, %v384_v17  ;;  %v378_v20 = vmax.f32 %v343_v10, %v374_v18 }
 0x145   : > { %v390_v21 = vmax.f32 %v378_v20, %v388_v19 }
 0x147   : > { %395 = vst.msk [vmem:[#allocation3 + $0x6] sm:$0x3] %vm391_vm1, %v390_v21 }
 0x148 PF: > { %v421_v22 = vld [vmem:[#allocation2] sm:$0x3]  ;;  %415 = vmatpush.msra.mxu3 %v1356_v1  ;;  %vm397_vm3 = vcmask 130048   ;;  %vm479_vm4 = vcmask 1041408   ;;  %vm454_vm5 = vcmask 15360   ;;  %vm597_vm10 = vcmask 523264  }
 0x149   : > { %v396_v23 = vld [vmem:[%s1446_s2] sm:$0x3]  ;;  %422 = vxpose.xlu0.b32.start.end [1/1] (short) (narrow) %v421_v22, 64  ;;  %vm623_vm11 = vcmask 64512   ;;  %s816_s5 = sshll.u32 %s1134_s25, 2  ;;  %s1476_s6 = sld [smem:[#allocation19_spill]] }
 0x14a   : > { %416 = vmatpush.msra.mxu3 %v1354_v0  ;;  %s666_s11 = sadd.s32 %s1130_s24, %s816_s5  ;;  %s669_s14 = sshll.u32 %s1358_s29, 4  ;;  %s670_s14 = int_to_ptr.vmem [resolvable:$true] %s669_s14 }
 0x14b   : > { %802 = vmatmul.msk.f32.vlgmr.msra.gmra.mxu3 %vm397_vm3, %v396_v23  ;;  %s817_s12 = sshll.u32 %s666_s11, 3  ;;  %s656_s25 = scalar_lea.sflag [#allocation6], %s1341_s27 }
 0x14f   : > { %s668_s10 = scalar_lea.hbm %s1476_s6, %s817_s12  ;;  %s1040_s0 = scalar_lea.hbm %s1476_s6, 64 }
 0x150   : > { %s671_s18 = sshll.u32 %s668_s10, 4  ;;  %s672_s18 = int_to_ptr.hbm [resolvable:$true] %s671_s18 }
 0x151   : > { %s1034_s24 = sshra.s32 %s672_s18, 4  ;;  %s1035_s24 = int_to_ptr.hbm [resolvable:$true] %s1034_s24 }
 0x152   : > { %s1036_s9 = scalar_lea.hbm %s1035_s24, 16  ;;  %p1041_p4 = scmp.lt.s32.totalorder %s1035_s24, %s1476_s6 }
 0x153   : > { %p1037_p10 = scmp.ne.s32.totalorder %s1035_s24, %s1036_s9  ;;  %p1042_p6 = scmp.lt.s32.totalorder %s1040_s0, %s1036_s9 }
 0x155   : > { %p1038_p12 = pnand %p1037_p10, %p1266_p8  ;;  %p1043_p3 = por %p1042_p6, %p1041_p4 }
 0x157   : > { %p1039_p1 = pneg %p1038_p12 }
 0x159   : > { %p1044_p7 = pnand %p1043_p3, %p1039_p1 }
 0x1ce   : > { %v418_v24 = vpop.f32.mrf.mxu3 }
 0x1cf   : > { %803 = vmatpush.msk.msra.mxu0 %vm479_vm4, %v418_v24  ;;  %825 = vmatpush.msk.msra.mxu1 %vm479_vm4, %v418_v24 }
 0x1ed   : > { %v438_v25 = vpop.trf.xlu0 }
 0x1ee   : > { %804 = vmatmul.msk.f32.vlgmr.msra.gmra.mxu0 %vm454_vm5, %v438_v25 }
 0x1f5   : > { %v439_v26 = vpop.trf.xlu0 }
 0x1f6   : > { %805 = vmatmul.msk.f32.gmra.mxu0 %vm454_vm5, %v439_v26 }
 0x1fd   : > { %v440_v27 = vpop.trf.xlu0 }
 0x1fe   : > { %806 = vmatmul.msk.f32.gmra.mxu0 %vm454_vm5, %v440_v27 }
 0x205   : > { %v441_v28 = vpop.trf.xlu0 }
 0x206   : > { %807 = vmatmul.msk.f32.gmra.mxu0 %vm454_vm5, %v441_v28 }
 0x20d   : > { %v442_v29 = vpop.trf.xlu0 }
 0x20e   : > { %808 = vmatmul.msk.f32.vlgmr.msra.gmra.mxu1 %vm454_vm5, %v442_v29 }
 0x215   : > { %v443_v30 = vpop.trf.xlu0 }
 0x216   : > { %809 = vmatmul.msk.f32.gmra.mxu1 %vm454_vm5, %v443_v30 }
 0x21d   : > { %v444_v31 = vpop.trf.xlu0 }
 0x21e   : > { %810 = vmatmul.msk.f32.gmra.mxu1 %vm454_vm5, %v444_v31 }
 0x225   : > { %v445_v32 = vpop.trf.xlu0 }
 0x226   : > { %811 = vmatmul.msk.f32.gmra.mxu1 %vm454_vm5, %v445_v32 }
 0x26b   : > { %v500_v33 = vpop.f32.mrf.mxu0 }
 0x273   : > { %v503_v35 = vpop.f32.mrf.mxu0 }
 0x27b   : > { %v506_v37 = vpop.f32.mrf.mxu0 }
 0x283   : > { %v509_v40 = vpop.f32.mrf.mxu0 }
 0x28b   : > { %v512_v34 = vpop.f32.mrf.mxu1 }
 0x28c   : > { %v524_v42 = vmax.f32 %v500_v33, %v512_v34 }
 0x293   : > { %v515_v36 = vpop.f32.mrf.mxu1 }
 0x294   : > { %v525_v39 = vmax.f32 %v503_v35, %v515_v36 }
 0x296   : > { %v528_v45 = vmax.f32 %v524_v42, %v525_v39 }
 0x29b   : > { %v518_v38 = vpop.f32.mrf.mxu1 }
 0x29c   : > { %v526_v43 = vmax.f32 %v506_v37, %v518_v38 }
 0x2a3   : > { %v521_v41 = vpop.f32.mrf.mxu1 }
 0x2a4   : > { %v527_v44 = vmax.f32 %v509_v40, %v521_v41 }
 0x2a6   : > { %v529_v46 = vmax.f32 %v526_v43, %v527_v44 }
 0x2a8   : > { %v530_v47 = vmax.f32 %v528_v45, %v529_v46 }
 0x2aa   : > { %v531_v48 = vrot.slane %v530_v47, 4 }
 0x2ac   : > { %v532_v49 = vmax.f32 %v530_v47, %v531_v48  ;;  %v596_v47 = vld [vmem:[#allocation3] sm:$0xff] }
 0x2ad   : > { %v621_v48 = vld [vmem:[%s1448_s4] sm:$0xff] }
 0x2ae   : > { %v533_v50 = vrot.slane %v532_v49, 2 }
 0x2b0   : > { %v534_v51 = vmax.f32 %v532_v49, %v533_v50  ;;  %v622_v50 = vld [vmem:[%s1448_s4 + $0x8] sm:$0xff] }
 0x2b2   : > { %v535_v52 = vrot.slane %v534_v51, 1 }
 0x2b4   : > { %v536_v53 = vmax.f32 %v534_v51, %v535_v52 }
 0x2b6   : > { %v537_v54 = vsub.f32 %v500_v33, %v536_v53  ;;  %v538_v55 = vsub.f32 %v503_v35, %v536_v53  ;;  %v539_v56 = vsub.f32 %v506_v37, %v536_v53  ;;  %v540_v57 = vsub.f32 %v509_v40, %v536_v53 }
 0x2b7   : > { %v541_v60 = vsub.f32 %v512_v34, %v536_v53  ;;  %v542_v62 = vsub.f32 %v515_v36, %v536_v53  ;;  %v543_v2 = vsub.f32 %v518_v38, %v536_v53  ;;  %v544_v4 = vsub.f32 %v521_v41, %v536_v53 }
 0x2b8   : > { %v545_v58 = vmul.f32 1.442695, %v537_v54  ;;  %v547_v59 = vmul.f32 1.442695, %v538_v55  ;;  %v549_v61 = vmul.f32 1.442695, %v539_v56 }
 0x2b9   : > { %v551_v63 = vmul.f32 1.442695, %v540_v57  ;;  %v553_v3 = vmul.f32 1.442695, %v541_v60  ;;  %v555_v5 = vmul.f32 1.442695, %v542_v62 }
 0x2ba   : > { %942 = vpow2.f32 %v545_v58  ;;  %v557_v8 = vmul.f32 1.442695, %v543_v2  ;;  %v559_v11 = vmul.f32 1.442695, %v544_v4 }
 0x2bb   : > { %944 = vpow2.f32 %v547_v59 }
 0x2bc   : > { %946 = vpow2.f32 %v549_v61 }
 0x2bd   : > { %948 = vpow2.f32 %v551_v63 }
 0x2be   : > { %950 = vpow2.f32 %v553_v3 }
 0x2bf   : > { %952 = vpow2.f32 %v555_v5 }
 0x2c0   : > { %v943_v6 = vpop.eup %942  ;;  %954 = vpow2.f32 %v557_v8 }
 0x2c1   : > { %v945_v7 = vpop.eup %944  ;;  %956 = vpow2.f32 %v559_v11 }
 0x2c2   : > { %v561_v9 = vadd.f32 %v945_v7, %v943_v6  ;;  %v947_v10 = vpop.eup %946 }
 0x2c3   : > { %v949_v13 = vpop.eup %948 }
 0x2c4   : > { %v562_v12 = vadd.f32 %v947_v10, %v561_v9  ;;  %v951_v15 = vpop.eup %950 }
 0x2c5   : > { %v953_v17 = vpop.eup %952 }
 0x2c6   : > { %v563_v14 = vadd.f32 %v949_v13, %v562_v12  ;;  %v955_v19 = vpop.eup %954 }
 0x2c7   : > { %v957_v21 = vpop.eup %956 }
 0x2c8   : > { %v564_v16 = vadd.f32 %v951_v15, %v563_v14 }
 0x2ca   : > { %v565_v18 = vadd.f32 %v953_v17, %v564_v16 }
 0x2cc   : > { %v566_v20 = vadd.f32 %v955_v19, %v565_v18 }
 0x2ce   : > { %v567_v22 = vadd.f32 %v957_v21, %v566_v20 }
 0x2d0   : > { %v568_v23 = vrot.slane %v567_v22, 4 }
 0x2d2   : > { %v569_v24 = vadd.f32 %v568_v23, %v567_v22 }
 0x2d4   : > { %v570_v25 = vrot.slane %v569_v24, 2 }
 0x2d6   : > { %v571_v26 = vadd.f32 %v570_v25, %v569_v24 }
 0x2d8   : > { %v572_v27 = vrot.slane %v571_v26, 1 }
 0x2da   : > { %v573_v28 = vadd.f32 %v572_v27, %v571_v26 }
 0x2dc   : > { %958 = vrcp.f32 %v573_v28  ;;  %v585_v32 = vand.u32 2147483648, %v573_v28  ;;  %v583_v34 = vand.u32 2147483647, %v573_v28  ;;  %vm579_vm7 = vweird.f32 %v573_v28 }
 0x2de   : > { %v586_v36 = vor.u32 1.1754944e-38, %v585_v32  ;;  %vm584_vm9 = vcmp.eq.f32.partialorder %v583_v34, 8.507059e+37 }
 0x2e2   : > { %v959_v29 = vpop.eup %958 }
 0x2e3   : > { %v575_v30 = vmul.f32 %v959_v29, %v573_v28  ;;  %vm580_vm6 = vweird.f32 %v959_v29 }
 0x2e4   : > { %vm581_vm8 = vmor %vm579_vm7, %vm580_vm6 }
 0x2e5   : > { %v576_v31 = vsub.f32 1.0, %v575_v30 }
 0x2e7   : > { %v577_v33 = vmul.f32 %v959_v29, %v576_v31 }
 0x2e9   : > { %v578_v35 = vadd.f32 %v959_v29, %v577_v33 }
 0x2eb   : > { %v582_v37 = vsel %vm581_vm8, %v959_v29, %v578_v35 }
 0x2ec   : > { %v587_v38 = vsel %vm584_vm9, %v586_v36, %v582_v37 }
 0x2ed   : > { %v595_v39 = vmul.f32 %v957_v21, %v587_v38  ;;  %v594_v40 = vmul.f32 %v955_v19, %v587_v38  ;;  %v593_v41 = vmul.f32 %v953_v17, %v587_v38  ;;  %v592_v42 = vmul.f32 %v951_v15, %v587_v38 }
 0x2ee   : > { %v591_v43 = vmul.f32 %v949_v13, %v587_v38  ;;  %v590_v44 = vmul.f32 %v947_v10, %v587_v38  ;;  %v589_v45 = vmul.f32 %v945_v7, %v587_v38  ;;  %v588_v46 = vmul.f32 %v943_v6, %v587_v38 }
 0x2ef   : > { %609 = vmatpush.msra.mxu2 %v595_v39 }
 0x2f1   : > { %610 = vmatpush.msra.mxu2 %v594_v40 }
 0x2f3   : > { %611 = vmatpush.msra.mxu2 %v593_v41 }
 0x2f5   : > { %612 = vmatpush.msra.mxu2 %v592_v42 }
 0x2f7   : > { %613 = vmatpush.msra.mxu2 %v591_v43 }
 0x2f9   : > { %614 = vmatpush.msra.mxu2 %v590_v44 }
 0x2fb   : > { %615 = vmatpush.msra.mxu2 %v589_v45 }
 0x2fd   : > { %616 = vmatpush.msra.mxu2 %v588_v46 }
 0x2fe   : > { %812 = vmatmul.msk.f32.vlgmr.msra.gmra.mxu2 %vm597_vm10, %v596_v47 }
 0x381   : > { %v618_v49 = vpop.f32.mrf.mxu2 }
 0x382   : > { %645 = vmatpush.msrb.mxu3 %v618_v49 }
 0x383   : > { %813 = vmatmul.msk.f32.vlgmr.msrb.gmra.mxu3 %vm623_vm11, %v621_v48 }
 0x38b   : > { %814 = vmatmul.msk.f32.gmra.mxu3 %vm623_vm11, %v622_v50 }
 0x406   : > { %v647_v51 = vpop.f32.mrf.mxu3 }
 0x407   : > { %v648_v52 = vadd.f32 %v647_v51, %v1354_v0 }
 0x409   : > { %653 = vst [vmem:[%s1358_s29] sm:$0xff] %v648_v52 }
 0x40e   : > { %v650_v53 = vpop.f32.mrf.mxu3 }
 0x40f   : > { %v651_v54 = vadd.f32 %v650_v53, %v1356_v1 }
 0x411   : > { %654 = vst [vmem:[%s1358_s29 + $0x8] sm:$0xff] %v651_v54 }
 0x412   : > { %1047 = shalt.err (!%p1044_p7)
}
 0x413   : > { %s1153_s27 = smov 128   ;;  %s1154_s29 = smov 256  }
 0x414   : > { %s1155_s12 = smov 8  }
 0x415   : > { %830 = dma.vmem_to_hbm [thread:$0]  (%p1266_p8), %s670_s14, 256, %s672_s18, %s656_s25, %s1153_s27, %s1154_s29, %s1155_s12  }
 0x416 PF: > { %p844_p11 = scmp.ge.s32.totalorder %s1146_s28, 2  ;;  %s686_s30 = sand.u32 1, %s1118_s21  }
 0x417   : > { %s687_s10 = scalar_lea.sflag [#allocation6], %s686_s30 }
 0x418   : > { %p840_p13 = pnand %p844_p11, %p1273_p9 }
 0x41a   : > { %p841_p0 = pneg %p840_p13 }
 0x41c   : > { %1101 = dma.done.wait (%p841_p0), %s687_s10, 256  }
 0x41d   : > { %1103 = vsyncadd (%p841_p0), %s687_s10, 4294967040  ;;  %s24_s28 = sadd.s32 1, %s1146_s28   ;;  %s1478_s25 = sld [smem:[#allocation13_spill]] }
 0x41e   : > { %p21_p5 = scmp.ge.s32.totalorder %s24_s28, 6   ;;  %s1479_s15 = sld [smem:[#allocation14_spill]] }
 0x41f   : > { %s1480_s27 = sld [smem:[#allocation15_spill]]  ;;  %s1481_s18 = smov %s1110_s19 }
 0x420   : > { %s1482_s19 = smov %s1114_s20  ;;  %s1483_s20 = smov %s1310_s16 }
 0x421   : > { %s1484_s21 = smov %s1122_s22  ;;  %s1485_s22 = smov %s1126_s23 }
 0x422   : > { %s1486_s23 = smov %s1287_s17  ;;  %s1487_s24 = smov %s1138_s26 }
 0x423   :  { %23 = sbr.rel (!%p21_p5) target bundleno = 14 (0xe), region = 102 }
 0x424   : > { %s1488_s26 = smov %s1479_s15 }
 0x428   :  { %693 = vsyncpa [#allocation5], 1 }
 0x429   :  { %695 = vsyncpa [#allocation5 + $0x1], 1 }
 0x42a   :  { %696 = vsyncpa [#allocation8], 1 }
 0x42b   :  { %698 = vsyncpa [#allocation8 + $0x1], 1 }
 0x42c   :  { %699 = vsyncpa [#allocation6], 1 }
 0x42d   :  { %701 = vsyncpa [#allocation6 + $0x1], 1 }

</bundles_post_ra>
